<compile_context>
chip_gen: v5e
topology: v5e:2x2
jax: 0.10.0
libtpu: 0.0.40
codegen_flags: <defaults>
</compile_context>

<pallas_src>
import jax
import jax.numpy as jnp
from jax.experimental import pallas as pl
from jax.experimental.pallas import tpu as pltpu

K = 256       # hidden width from the PyTorch module
LANE = 128    # TPU lane width: pad the output feature dim to this


def _round_up(n, m):
    return ((n + m - 1) // m) * m


def actor_kernel(x_ref, w1_ref, b1_ref, w2_ref, b2_ref, o_ref):
    # fc1: [bm, S] @ [S, K] -> [bm, K], bias + ReLU fused on the VPU.
    h = jnp.dot(x_ref[...], w1_ref[...], preferred_element_type=jnp.float32)
    h = jnp.maximum(h + b1_ref[...], 0.0)
    # out: [bm, K] @ [K, A_pad] -> [bm, A_pad], bias + tanh (EUP) fused.
    y = jnp.dot(h, w2_ref[...], preferred_element_type=jnp.float32)
    o_ref[...] = jnp.tanh(y + b2_ref[...]).astype(o_ref.dtype)


def actor_forward(x, w1, b1, w2, b2, *, bm=256):
    """Forward pass of the Actor.

    x:  [B, s_dim] f32
    w1: [s_dim, K] f32   (PyTorch fc1.weight transposed)
    b1: [1, K]     f32
    w2: [K, a_dim] f32   (PyTorch out.weight transposed)
    b2: [1, a_dim] f32
    returns [B, a_dim] f32
    """
    B, S = x.shape
    A = w2.shape[1]

    # ---- batch tiling: fill the MXU when B is large, one step when small ----
    bm_eff = min(bm, _round_up(B, 8))        # sublane-aligned tile, <= requested
    B_pad = _round_up(B, bm_eff)             # pad batch so the grid divides evenly
    if B_pad != B:
        x = jnp.pad(x, ((0, B_pad - B), (0, 0)))

    # ---- lane-dense output: pad feature dim of the second linear to 128 ----
    A_pad = _round_up(max(A, LANE), LANE)
    if A_pad != A:
        w2 = jnp.pad(w2, ((0, 0), (0, A_pad - A)))
        b2 = jnp.pad(b2, ((0, 0), (0, A_pad - A)))

    grid = (B_pad // bm_eff,)

    out = pl.pallas_call(
        actor_kernel,
        out_shape=jax.ShapeDtypeStruct((B_pad, A_pad), jnp.float32),
        grid_spec=pl.GridSpec(
            grid=grid,
            in_specs=[
                pl.BlockSpec((bm_eff, S), lambda i: (i, 0)),   # x tile (streamed)
                pl.BlockSpec((S, K), lambda i: (0, 0)),        # W1 (VMEM-resident)
                pl.BlockSpec((1, K), lambda i: (0, 0)),        # b1 (resident)
                pl.BlockSpec((K, A_pad), lambda i: (0, 0)),    # W2 (resident)
                pl.BlockSpec((1, A_pad), lambda i: (0, 0)),    # b2 (resident)
            ],
            out_specs=pl.BlockSpec((bm_eff, A_pad), lambda i: (i, 0)),
        ),
        compiler_params=pltpu.CompilerParams(
            dimension_semantics=("parallel",),
            # Resident weights ~160 KB + double-buffered x/out tiles; budget
            # generously but well under every generation's scoped VMEM.
            vmem_limit_bytes=16 * 1024 * 1024,
        ),
    )(x, w1, b1, w2, b2)

    # Strip batch / lane padding (pure layout plumbing in the wrapper).
    return out[:B, :A]


def init_actor_params(key, s_dim, a_dim):
    """Deterministic synthetic init mirroring the module's __init__ shapes.

    weight ~ N(0, 0.1) (as in the PyTorch code); biases use PyTorch's default
    Linear bias init range, purely deterministic here.
    """
    k1, k2, k3, k4 = jax.random.split(key, 4)
    # Stored transposed: [in, out] (PyTorch keeps [out, in]).
    w1 = 0.1 * jax.random.normal(k1, (s_dim, K), dtype=jnp.float32)
    w2 = 0.1 * jax.random.normal(k2, (K, a_dim), dtype=jnp.float32)
    b1 = jax.random.uniform(
        k3, (1, K), dtype=jnp.float32,
        minval=-1.0 / jnp.sqrt(s_dim), maxval=1.0 / jnp.sqrt(s_dim))
    b2 = jax.random.uniform(
        k4, (1, a_dim), dtype=jnp.float32,
        minval=-1.0 / jnp.sqrt(K), maxval=1.0 / jnp.sqrt(K))
    return w1, b1, w2, b2


def _ref_forward(x, w1, b1, w2, b2):
    return jnp.tanh(jnp.maximum(x @ w1 + b1, 0.0) @ w2 + b2)


if __name__ == "__main__":
    s_dim, a_dim = 32, 8
    key = jax.random.PRNGKey(0)
    kx, kp, kx2 = jax.random.split(key, 3)
    w1, b1, w2, b2 = init_actor_params(kp, s_dim, a_dim)

    # Small batch (single grid step, still lane-dense stores).
    B_small = 8
    x_small = jax.random.normal(kx, (B_small, s_dim), dtype=jnp.float32)
    out_small = jax.block_until_ready(actor_forward(x_small, w1, b1, w2, b2))
    ref_small = _ref_forward(x_small, w1, b1, w2, b2)
    assert out_small.shape == (B_small, a_dim)
    assert jnp.allclose(out_small, ref_small, atol=1e-5, rtol=1e-5), \
        "small-batch mismatch vs reference"

    # Larger, non-divisible batch exercises padding + multi-step parallel grid.
    B_big = 260
    x_big = jax.random.normal(kx2, (B_big, s_dim), dtype=jnp.float32)
    out_big = jax.block_until_ready(actor_forward(x_big, w1, b1, w2, b2, bm=256))
    ref_big = _ref_forward(x_big, w1, b1, w2, b2)
    assert out_big.shape == (B_big, a_dim)
    assert jnp.allclose(out_big, ref_big, atol=1e-5, rtol=1e-5), \
        "large-batch mismatch vs reference"

    print("KERNEL_OK")
</pallas_src>

<mosaic_0001>
module attributes {stable_mosaic.version = 11 : i64} {
  func.func @actor_kernel(%arg0: i32, %arg1: memref<8x32xf32, #tpu.memory_space<vmem>>, %arg2: memref<32x256xf32, #tpu.memory_space<vmem>>, %arg3: memref<1x256xf32, #tpu.memory_space<vmem>>, %arg4: memref<256x128xf32, #tpu.memory_space<vmem>>, %arg5: memref<1x128xf32, #tpu.memory_space<vmem>>, %arg6: memref<8x128xf32, #tpu.memory_space<vmem>>) attributes {dimension_semantics = [#tpu.dimension_semantics<parallel>], iteration_bounds = array<i64: 1>, scalar_prefetch = 0 : i64, scratch_operands = 0 : i64, tpu.core_type = #tpu.core_type<tc>, window_params = [{transform_indices = @transform_0, window_bounds = array<i64: 8, 32>}, {pipeline_mode = #tpu.pipeline_mode<synchronous>, transform_indices = @transform_1, window_bounds = array<i64: 32, 256>}, {pipeline_mode = #tpu.pipeline_mode<synchronous>, transform_indices = @transform_2, window_bounds = array<i64: 1, 256>}, {pipeline_mode = #tpu.pipeline_mode<synchronous>, transform_indices = @transform_3, window_bounds = array<i64: 256, 128>}, {pipeline_mode = #tpu.pipeline_mode<synchronous>, transform_indices = @transform_4, window_bounds = array<i64: 1, 128>}, {transform_indices = @transform_5, window_bounds = array<i64: 8, 128>}]} {
    %c0 = arith.constant 0 : index
    %c0_0 = arith.constant 0 : index
    %0 = vector.load %arg1[%c0, %c0_0] : memref<8x32xf32, #tpu.memory_space<vmem>>, vector<8x32xf32>
    %c0_1 = arith.constant 0 : index
    %c0_2 = arith.constant 0 : index
    %1 = vector.load %arg2[%c0_1, %c0_2] : memref<32x256xf32, #tpu.memory_space<vmem>>, vector<32x256xf32>
    %cst = arith.constant dense<0.000000e+00> : vector<8x256xf32>
    %2 = tpu.matmul %0, %1, %cst {dimension_numbers = #tpu.dot_dimension_numbers<[1], [0], [0], [1], [0, 0, 1, 1], [], []>} : vector<8x32xf32>, vector<32x256xf32>, vector<8x256xf32> -> vector<8x256xf32>
    %c0_3 = arith.constant 0 : index
    %c0_4 = arith.constant 0 : index
    %3 = vector.load %arg3[%c0_3, %c0_4] : memref<1x256xf32, #tpu.memory_space<vmem>>, vector<1x256xf32>
    %4 = vector.broadcast %3 : vector<1x256xf32> to vector<8x256xf32>
    %5 = arith.addf %2, %4 : vector<8x256xf32>
    %cst_5 = arith.constant 0.000000e+00 : f32
    %6 = vector.broadcast %cst_5 : f32 to vector<8x256xf32>
    %7 = arith.maximumf %5, %6 : vector<8x256xf32>
    %c0_6 = arith.constant 0 : index
    %c0_7 = arith.constant 0 : index
    %8 = vector.load %arg4[%c0_6, %c0_7] : memref<256x128xf32, #tpu.memory_space<vmem>>, vector<256x128xf32>
    %cst_8 = arith.constant dense<0.000000e+00> : vector<8x128xf32>
    %9 = tpu.matmul %7, %8, %cst_8 {dimension_numbers = #tpu.dot_dimension_numbers<[1], [0], [0], [1], [0, 0, 1, 1], [], []>} : vector<8x256xf32>, vector<256x128xf32>, vector<8x128xf32> -> vector<8x128xf32>
    %c0_9 = arith.constant 0 : index
    %c0_10 = arith.constant 0 : index
    %10 = vector.load %arg5[%c0_9, %c0_10] : memref<1x128xf32, #tpu.memory_space<vmem>>, vector<1x128xf32>
    %11 = vector.broadcast %10 : vector<1x128xf32> to vector<8x128xf32>
    %12 = arith.addf %9, %11 : vector<8x128xf32>
    %13 = math.tanh %12 : vector<8x128xf32>
    %c0_11 = arith.constant 0 : index
    %c0_12 = arith.constant 0 : index
    %14 = vector.load %arg6[%c0_11, %c0_12] : memref<8x128xf32, #tpu.memory_space<vmem>>, vector<8x128xf32>
    tpu.vector_store %arg6[%c0_11, %c0_12], %13 {strides = array<i32>} : memref<8x128xf32, #tpu.memory_space<vmem>>, vector<8x128xf32>,
    return
  }
  func.func @transform_0(%arg0: i32) -> (i32, i32) {
    %c0_i32 = arith.constant 0 : i32
    %c0_i32_0 = arith.constant 0 : i32
    return %arg0, %c0_i32 : i32, i32
  }
  func.func @transform_1(%arg0: i32) -> (i32, i32) {
    %c0_i32 = arith.constant 0 : i32
    %c0_i32_0 = arith.constant 0 : i32
    %c0_i32_1 = arith.constant 0 : i32
    return %c0_i32, %c0_i32_0 : i32, i32
  }
  func.func @transform_2(%arg0: i32) -> (i32, i32) {
    %c0_i32 = arith.constant 0 : i32
    %c0_i32_0 = arith.constant 0 : i32
    %c0_i32_1 = arith.constant 0 : i32
    return %c0_i32, %c0_i32_0 : i32, i32
  }
  func.func @transform_3(%arg0: i32) -> (i32, i32) {
    %c0_i32 = arith.constant 0 : i32
    %c0_i32_0 = arith.constant 0 : i32
    %c0_i32_1 = arith.constant 0 : i32
    return %c0_i32, %c0_i32_0 : i32, i32
  }
  func.func @transform_4(%arg0: i32) -> (i32, i32) {
    %c0_i32 = arith.constant 0 : i32
    %c0_i32_0 = arith.constant 0 : i32
    %c0_i32_1 = arith.constant 0 : i32
    return %c0_i32, %c0_i32_0 : i32, i32
  }
  func.func @transform_5(%arg0: i32) -> (i32, i32) {
    %c0_i32 = arith.constant 0 : i32
    %c0_i32_0 = arith.constant 0 : i32
    return %arg0, %c0_i32 : i32, i32
  }
}

</mosaic_0001>

<bundles_post_ra>
// kernel: tpu_custom_call.1
= control target key start
LH: loop header
LB: loop body
LE: loop exit
PB: predicated region body
PF: predicated region fallthrough
CT: control target
= control target key end

     0   :  { %10 = vsyncpa [#allocation3], 0  ;;  %s437_s0 = inlined_call_operand.hbm [shape: f32[8,32], index: 0, kind: input, shape index: {}]   ;;  %s438_s1 = inlined_call_operand.hbm [shape: f32[32,256], index: 1, kind: input, shape index: {}]   ;;  %s439_s2 = inlined_call_operand.hbm [shape: f32[1,256], index: 2, kind: input, shape index: {}]   ;;  %s440_s3 = inlined_call_operand.hbm [shape: f32[256,128], index: 3, kind: input, shape index: {}]   ;;  %s441_s4 = inlined_call_operand.vmem [shape: f32[1,128], index: 4, kind: input, shape index: {}]   ;;  %s442_s5 = inlined_call_operand.hbm [shape: f32[8,128], index: 5, kind: output, shape index: {}]  }
   0x1   :  { %11 = vsyncpa [#allocation6], 0 }
   0x2   :  { %12 = vsyncpa [#allocation9], 0  ;;  %s29_s20 = sshll.u32 %s438_s1, 4  ;;  %s30_s20 = int_to_ptr.hbm [resolvable:$true] %s29_s20 }
   0x3   :  { %13 = vsyncpa [#allocation4], 0  ;;  %s380_s21 = smov [#allocation5]   ;;  %s19_s25 = sshll.u32 %s437_s0, 4  ;;  %s20_s25 = int_to_ptr.hbm [resolvable:$true] %s19_s25 }
   0x4   :  { %s31_s22 = sshll.u32 %s380_s21, 4  ;;  %s381_s26 = smov 256   ;;  %s32_s22 = int_to_ptr.vmem [resolvable:$true] %s31_s22 }
   0x5   :  { %s382_s27 = smov 16   ;;  %s383_s28 = smov [#allocation2]  }
   0x6   :  { %37 = dma.hbm_to_vmem [thread:$0]  %s30_s20, 1024, %s32_s22, [#allocation6], %s381_s26, %s381_s26, %s382_s27  }
   0x7   :  { %s21_s29 = sshll.u32 %s383_s28, 4  ;;  %s43_s7 = sshll.u32 %s439_s2, 4  ;;  %s22_s29 = int_to_ptr.vmem [resolvable:$true] %s21_s29  ;;  %s44_s7 = int_to_ptr.hbm [resolvable:$true] %s43_s7 }
   0x8   :  { %24 = dma.hbm_to_vmem [thread:$0]  %s20_s25, 128, %s22_s29, [#allocation3]  }
   0x9   :  { %s53_s9 = sshll.u32 %s440_s3, 4  ;;  %s384_s10 = smov [#allocation7]   ;;  %s54_s9 = int_to_ptr.hbm [resolvable:$true] %s53_s9 }
   0xa   :  { %s45_s11 = sshll.u32 %s384_s10, 4  ;;  %s385_s0 = smov [#allocation8]   ;;  %s46_s11 = int_to_ptr.vmem [resolvable:$true] %s45_s11 }
   0xb   :  { %48 = dma.hbm_to_vmem [thread:$0]  %s44_s7, 32, %s46_s11, [#allocation6]  }
   0xc   :  { %s55_s12 = sshll.u32 %s385_s0, 4  ;;  %s386_s13 = smov 128   ;;  %s56_s12 = int_to_ptr.vmem [resolvable:$true] %s55_s12 }
   0xd   :  { %s387_s14 = smov 8  }
   0xe   :  { %61 = dma.hbm_to_vmem [thread:$0]  %s54_s9, 4096, %s56_s12, [#allocation9], %s386_s13, %s386_s13, %s387_s14  }
   0xf   :  { %372 = dma.done.wait [#allocation3], 128  }
  0x10   :  { %373 = vsyncadd [#allocation3], 4294967168 }
  0x11   :  { %374 = dma.done.wait [#allocation6], 1056  }
  0x12   :  { %375 = vsyncadd [#allocation6], 4294966240 }
  0x13   :  { %376 = dma.done.wait [#allocation9], 4096  }
  0x14   :  { %377 = vsyncadd [#allocation9], 4294963200  ;;  %v87_v0 = vld [vmem:[#allocation5 + $0x30] sm:$0xff]  ;;  %v85_v1 = vld [vmem:[#allocation5 + $0x20] sm:$0xff]  ;;  %vm95_vm0 = vcmask 261120   ;;  %s388_s15 = smov [#allocation10]  }
  0x15   :  { %v88_v2 = vld [vmem:[#allocation5 + $0x38] sm:$0xff]  ;;  %111 = vmatpush.msra.mxu0 %v87_v0  ;;  %v86_v3 = vld [vmem:[#allocation5 + $0x28] sm:$0xff]  ;;  %v83_v4 = vld [vmem:[#allocation5 + $0x10] sm:$0xff]  ;;  %s224_s16 = sshll.u32 %s388_s15, 4  ;;  %s226_s19 = sshll.u32 %s442_s5, 4  ;;  %s225_s16 = int_to_ptr.vmem [resolvable:$true] %s224_s16  ;;  %s227_s19 = int_to_ptr.hbm [resolvable:$true] %s226_s19 }
  0x16   :  { %131 = vmatpush.msra.mxu1 %v88_v2  ;;  %v84_v5 = vld [vmem:[#allocation5 + $0x18] sm:$0xff]  ;;  %v81_v9 = vld [vmem:[#allocation5] sm:$0xff]  ;;  %v82_v10 = vld [vmem:[#allocation5 + $0x8] sm:$0xff] }
  0x17   :  { %112 = vmatpush.msra.mxu0 %v85_v1  ;;  %v156_v6 = vld [vmem:[#allocation8 + $0x78] sm:$0xff]  ;;  %v155_v7 = vld [vmem:[#allocation8 + $0x70] sm:$0xff]  ;;  %v154_v13 = vld [vmem:[#allocation8 + $0x68] sm:$0xff] }
  0x18   :  { %132 = vmatpush.msra.mxu1 %v86_v3  ;;  %v172_v8 = vld [vmem:[#allocation8 + $0xf8] sm:$0xff]  ;;  %177 = vmatpush.msra.mxu2 %v156_v6  ;;  %v171_v11 = vld [vmem:[#allocation8 + $0xf0] sm:$0xff]  ;;  %v170_v14 = vld [vmem:[#allocation8 + $0xe8] sm:$0xff] }
  0x19   :  { %197 = vmatpush.msra.mxu3 %v172_v8  ;;  %113 = vmatpush.msra.mxu0 %v83_v4  ;;  %v80_v12 = vld [vmem:[#allocation2] sm:$0xff]  ;;  %v153_v15 = vld [vmem:[#allocation8 + $0x60] sm:$0xff]  ;;  %v150_v21 = vld [vmem:[#allocation8 + $0x48] sm:$0xff] }
  0x1a   :  { %133 = vmatpush.msra.mxu1 %v84_v5  ;;  %178 = vmatpush.msra.mxu2 %v155_v7  ;;  %v169_v16 = vld [vmem:[#allocation8 + $0xe0] sm:$0xff]  ;;  %v152_v17 = vld [vmem:[#allocation8 + $0x58] sm:$0xff]  ;;  %v151_v19 = vld [vmem:[#allocation8 + $0x50] sm:$0xff] }
  0x1b   :  { %198 = vmatpush.msra.mxu3 %v171_v11  ;;  %114 = vmatpush.msra.mxu0 %v81_v9  ;;  %v168_v18 = vld [vmem:[#allocation8 + $0xd8] sm:$0xff]  ;;  %v167_v20 = vld [vmem:[#allocation8 + $0xd0] sm:$0xff]  ;;  %v166_v22 = vld [vmem:[#allocation8 + $0xc8] sm:$0xff] }
  0x1c   :  { %134 = vmatpush.msra.mxu1 %v82_v10  ;;  %238 = vmatmul.msk.f32.vlgmr.msra.gmra.mxu0 %vm95_vm0, %v80_v12  ;;  %v149_v23 = vld [vmem:[#allocation8 + $0x40] sm:$0xff]  ;;  %v148_v25 = vld [vmem:[#allocation8 + $0x38] sm:$0xff]  ;;  %v147_v27 = vld [vmem:[#allocation8 + $0x30] sm:$0xff] }
  0x1d   :  { %239 = vmatmul.msk.f32.vlgmr.msra.gmra.mxu1 %vm95_vm0, %v80_v12  ;;  %179 = vmatpush.msra.mxu2 %v154_v13  ;;  %v165_v24 = vld [vmem:[#allocation8 + $0xc0] sm:$0xff]  ;;  %v164_v26 = vld [vmem:[#allocation8 + $0xb8] sm:$0xff]  ;;  %v163_v28 = vld [vmem:[#allocation8 + $0xb0] sm:$0xff] }
  0x1e   :  { %199 = vmatpush.msra.mxu3 %v170_v14  ;;  %v146_v29 = vld [vmem:[#allocation8 + $0x28] sm:$0xff]  ;;  %v145_v31 = vld [vmem:[#allocation8 + $0x20] sm:$0xff]  ;;  %v144_v33 = vld [vmem:[#allocation8 + $0x18] sm:$0xff] }
  0x1f   :  { %180 = vmatpush.msra.mxu2 %v153_v15  ;;  %v162_v30 = vld [vmem:[#allocation8 + $0xa8] sm:$0xff]  ;;  %v161_v32 = vld [vmem:[#allocation8 + $0xa0] sm:$0xff]  ;;  %v143_v34 = vld [vmem:[#allocation8 + $0x10] sm:$0xff] }
  0x20   :  { %200 = vmatpush.msra.mxu3 %v169_v16  ;;  %v160_v35 = vld [vmem:[#allocation8 + $0x98] sm:$0xff]  ;;  %v142_v36 = vld [vmem:[#allocation8 + $0x8] sm:$0xff]  ;;  %v159_v37 = vld [vmem:[#allocation8 + $0x90] sm:$0xff] }
  0x21   :  { %181 = vmatpush.msra.mxu2 %v152_v17  ;;  %v141_v38 = vld [vmem:[#allocation8] sm:$0xff]  ;;  %v158_v39 = vld [vmem:[#allocation8 + $0x88] sm:$0xff]  ;;  %v89_v41 = vld [vmem:[#allocation7] sm:$0x3] }
  0x22   :  { %201 = vmatpush.msra.mxu3 %v168_v18  ;;  %v157_v40 = vld [vmem:[#allocation8 + $0x80] sm:$0xff]  ;;  %v91_v42 = vperm.slane %v89_v41, 0  ;;  %v92_v43 = vperm.slane %v89_v41, 1  ;;  %v249_v50 = vld [vmem:[%s441_s4] ss:$0 sm:$0xff] }
  0x23   :  { %182 = vmatpush.msra.mxu2 %v151_v19 }
  0x24   :  { %202 = vmatpush.msra.mxu3 %v167_v20 }
  0x25   :  { %183 = vmatpush.msra.mxu2 %v150_v21 }
  0x26   :  { %203 = vmatpush.msra.mxu3 %v166_v22 }
  0x27   :  { %184 = vmatpush.msra.mxu2 %v149_v23 }
  0x28   :  { %204 = vmatpush.msra.mxu3 %v165_v24 }
  0x29   :  { %185 = vmatpush.msra.mxu2 %v148_v25 }
  0x2a   :  { %205 = vmatpush.msra.mxu3 %v164_v26 }
  0x2b   :  { %186 = vmatpush.msra.mxu2 %v147_v27 }
  0x2c   :  { %206 = vmatpush.msra.mxu3 %v163_v28 }
  0x2d   :  { %187 = vmatpush.msra.mxu2 %v146_v29 }
  0x2e   :  { %207 = vmatpush.msra.mxu3 %v162_v30 }
  0x2f   :  { %188 = vmatpush.msra.mxu2 %v145_v31 }
  0x30   :  { %208 = vmatpush.msra.mxu3 %v161_v32 }
  0x31   :  { %189 = vmatpush.msra.mxu2 %v144_v33 }
  0x32   :  { %209 = vmatpush.msra.mxu3 %v160_v35 }
  0x33   :  { %190 = vmatpush.msra.mxu2 %v143_v34 }
  0x34   :  { %210 = vmatpush.msra.mxu3 %v159_v37 }
  0x35   :  { %191 = vmatpush.msra.mxu2 %v142_v36 }
  0x36   :  { %211 = vmatpush.msra.mxu3 %v158_v39 }
  0x37   :  { %192 = vmatpush.msra.mxu2 %v141_v38 }
  0x38   :  { %212 = vmatpush.msra.mxu3 %v157_v40 }
  0x99   :  { %v116_v44 = vpop.f32.mrf.mxu0 }
  0x9a   :  { %v136_v45 = vpop.f32.mrf.mxu1  ;;  %v117_v46 = vadd.f32 %v116_v44, %v91_v42 }
  0x9b   :  { %v137_v47 = vadd.f32 %v136_v45, %v92_v43 }
  0x9c   :  { %v139_v48 = vmax.f32 %v117_v46, 0.0 }
  0x9d   :  { %v140_v49 = vmax.f32 %v137_v47, 0.0 }
  0x9e   :  { %193 = vmatmul.f32.vlgmr.msra.gmra.mxu2 %v139_v48 }
  0x9f   :  { %213 = vmatmul.f32.vlgmr.msra.gmra.mxu3 %v140_v49 }
 0x121   :  { %v194_v51 = vpop.f32.mrf.mxu2 }
 0x122   :  { %v214_v52 = vpop.f32.mrf.mxu3  ;;  %v195_v53 = vadd.f32 %v249_v50, %v194_v51 }
 0x124   :  { %v215_v54 = vadd.f32 %v214_v52, %v195_v53 }
 0x126   :  { %250 = vtanh.f32 %v215_v54 }
 0x12c   :  { %v251_v55 = vpop.eup %250 }
 0x12d   :  { %218 = vst [vmem:[#allocation10] sm:$0xff] %v251_v55 }
 0x12e   :  { %229 = dma.vmem_to_hbm [thread:$0]  %s225_s16, 128, %s227_s19, [#allocation4]  }
 0x12f   :  { %378 = dma.done.wait [#allocation4], 128  }
 0x130   :  { %379 = vsyncadd [#allocation4], 4294967168 }
 0x131   :  { %234 = vsyncpa [#allocation3], 1 }
 0x132   :  { %235 = vsyncpa [#allocation6], 1 }
 0x133   :  { %236 = vsyncpa [#allocation9], 1 }
 0x134   :  { %237 = vsyncpa [#allocation4], 1 }

</bundles_post_ra>
